<compile_context>
chip_gen: v7x
topology: tpu7x:2x2x1
jax: 0.10.0
libtpu: 0.0.40
codegen_flags: <defaults>
</compile_context>

<pallas_src>
import functools
import math

import jax
import jax.numpy as jnp
from jax.experimental import pallas as pl
from jax.experimental.pallas import tpu as pltpu


def _round_up(n, m):
    return ((n + m - 1) // m) * m


# ----------------------------- Pallas kernel ------------------------------ #
def _actor_kernel(num_layers, action_dim, *refs):
    """Feature-major (batch-in-lanes) SAC actor forward for one batch tile."""
    if num_layers > 0:
        (x_ref, w1_ref, blat_ref, wh_ref, whead_ref, bhead_ref,
         eps_ref, out_ref) = refs
    else:
        (x_ref, w1_ref, blat_ref, whead_ref, bhead_ref,
         eps_ref, out_ref) = refs
        wh_ref = None

    A = action_dim
    half_log_2pi = 0.5 * math.log(2.0 * math.pi)

    # --- latent MLP: (H,S)@(S,Tb), then L x (H,H)@(H,Tb); f32 accumulation ---
    h = jnp.dot(w1_ref[...], x_ref[...], preferred_element_type=jnp.float32)
    h = jnp.maximum(h + blat_ref[0], 0.0)
    for i in range(num_layers):                           # static unroll
        h = jnp.dot(wh_ref[i], h.astype(wh_ref.dtype),
                    preferred_element_type=jnp.float32)
        h = jnp.maximum(h + blat_ref[i + 1], 0.0)

    # --- fused heads: one (2A,H)@(H,Tb) matmul -> [mu ; log_std] -------------
    head = jnp.dot(whead_ref[...], h.astype(whead_ref.dtype),
                   preferred_element_type=jnp.float32) + bhead_ref[...]
    mu = head[:A, :]                                      # sublane-aligned split
    log_std = jnp.clip(head[A:, :], -20.0, 2.0)
    std = jnp.exp(log_std)

    # --- reparameterized sample + Normal log-prob ----------------------------
    eps = eps_ref[...]
    z = mu + std * eps
    # (z - mu)/std == eps by construction -> no subtract, no divide.
    lp_elem = -0.5 * eps * eps - log_std - half_log_2pi

    # --- tanh squash + numerically stable log-det correction -----------------
    action = jnp.tanh(z)
    # log(1 - tanh(z)^2) = 2*(log2 - z - softplus(-2z)); stable replacement of
    # the module's log(1 - a^2 + 1e-6) epsilon trick.
    t = -2.0 * z
    softplus_t = jnp.maximum(t, 0.0) + jnp.log(1.0 + jnp.exp(-jnp.abs(t)))
    log1m_tanh2 = 2.0 * (math.log(2.0) - z - softplus_t)

    log_prob = jnp.sum(lp_elem - log1m_tanh2, axis=0, keepdims=True)  # (1,Tb)

    # --- single unmasked, lane-dense output store: [action ; log_prob] -------
    out_ref[...] = jnp.concatenate([action, log_prob],
                                   axis=0).astype(out_ref.dtype)


# ------------------------------ JAX wrapper ------------------------------- #
def actor_forward(x, params, eps, *, num_layers, epsilon=1e-6,
                  tile_b=2048, vmem_budget_bytes=12 * 1024 * 1024,
                  matmul_dtype=jnp.bfloat16):
    """Stochastic (deterministic=False) forward of the SAC Actor.

    `epsilon` is kept for API parity with the PyTorch module; the kernel uses
    the stable softplus log-det identity instead of the +eps trick.
    """
    del epsilon
    B = x.shape[0]
    x = x.reshape(B, -1)                                  # nn.Flatten
    S = x.shape[1]
    H = params["w1"].shape[1]
    A = params["w_mu"].shape[1]
    L = num_layers

    # ---- feature-major packing (batch in lanes); bf16 matmul operands -------
    x_t = x.T.astype(matmul_dtype)                        # (S, B)   bf16 stream
    eps_t = eps.T.astype(jnp.float32)                     # (A, B)   f32 (exact rsample parity)
    w1_t = params["w1"].T.astype(matmul_dtype)            # (H, S)
    w_head_t = jnp.concatenate([params["w_mu"], params["w_ls"]],
                               axis=1).T.astype(matmul_dtype)       # (2A, H)
    b_head_t = jnp.concatenate([params["b_mu"], params["b_ls"]],
                               axis=1).T.astype(jnp.float32)        # (2A, 1)
    if L > 0:
        b_lat = jnp.concatenate([params["b1"][None], params["b_hidden"]],
                                axis=0)                             # (L+1,1,H)
        w_hid_t = jnp.swapaxes(params["w_hidden"], 1, 2).astype(matmul_dtype)
    else:
        b_lat = params["b1"][None]                                  # (1,1,H)
        w_hid_t = None
    b_lat_t = jnp.transpose(b_lat, (0, 2, 1)).astype(jnp.float32)   # (L+1,H,1)

    # ---- tile size: lane-aligned, VMEM-budgeted, even #grid-steps (>= 2) ----
    # per-batch-column bytes: double-buffered streamed blocks + f32 working set
    bytes_per_col = (2 * S * 2 + 2 * A * 4 + 2 * (A + 1) * 4 + 6 * H * 4)
    cap = max(128, (vmem_budget_bytes // bytes_per_col) // 128 * 128)
    tile_b = max(128, (min(tile_b, cap) // 128) * 128)
    tile_b = min(tile_b, _round_up(-(-B // 2), 128))      # don't overpad small B
    B_pad = _round_up(B, 2 * tile_b)                      # even step count (v7x: 2 TCs)
    if B_pad != B:
        x_t = jnp.pad(x_t, ((0, 0), (0, B_pad - B)))
        eps_t = jnp.pad(eps_t, ((0, 0), (0, B_pad - B)))
    grid = (B_pad // tile_b,)

    batch_map = lambda i: (0, i)
    const2 = lambda i: (0, 0)
    const3 = lambda i: (0, 0, 0)

    # NOTE: weight/bias blocks use constant index_maps (VMEM-resident). Pallas
    # double-buffers them by default; at these dims that is a few KiB, so we
    # keep the default rather than request pipeline_mode=pl.Buffered(1).
    in_specs = [
        pl.BlockSpec((S, tile_b), batch_map),             # x   (streamed, bf16)
        pl.BlockSpec((H, S), const2),                     # w1  (resident)
        pl.BlockSpec((L + 1, H, 1), const3),              # packed latent biases
    ]
    args = [x_t, w1_t, b_lat_t]
    if L > 0:
        in_specs.append(pl.BlockSpec((L, H, H), const3))  # hidden weights
        args.append(w_hid_t)
    in_specs += [
        pl.BlockSpec((2 * A, H), const2),                 # fused head weight
        pl.BlockSpec((2 * A, 1), const2),                 # fused head bias
        pl.BlockSpec((A, tile_b), batch_map),             # eps (streamed, f32)
    ]
    args += [w_head_t, b_head_t, eps_t]
    out_spec = pl.BlockSpec((A + 1, tile_b), batch_map)   # [action ; log_prob]

    flops = 2 * B_pad * (S * H + L * H * H + H * 2 * A)
    transcendentals = 4 * B_pad * A                       # exp(log_std), tanh, exp, log
    bytes_accessed = int(
        S * B_pad * 2 + A * B_pad * 4                     # x (bf16) + eps (f32)
        + (H * S + L * H * H + 2 * A * H) * 2             # weights (bf16)
        + ((L + 1) * H + 2 * A) * 4                       # biases (f32)
        + (A + 1) * B_pad * 4)                            # output (f32)
    cost = pl.CostEstimate(flops=flops, transcendentals=transcendentals,
                           bytes_accessed=bytes_accessed)

    # VMEM: streamed blocks (x2 buffers) + resident weights (x2) + temporaries.
    est_vmem = (2 * tile_b * (S * 2 + A * 4 + (A + 1) * 4)
                + 4 * (H * S + L * H * H + 2 * A * H)
                + 8 * ((L + 1) * H + 2 * A)
                + 8 * H * tile_b * 4)
    vmem_limit = int(min(64 << 20, max(32 << 20, 2 * est_vmem)))

    out = pl.pallas_call(
        functools.partial(_actor_kernel, L, A),
        out_shape=jax.ShapeDtypeStruct((A + 1, B_pad), jnp.float32),
        grid=grid,
        in_specs=in_specs,
        out_specs=out_spec,
        compiler_params=pltpu.CompilerParams(
            dimension_semantics=("parallel",),
            vmem_limit_bytes=vmem_limit),
        cost_estimate=cost,
    )(*args)

    action = out[:A, :B].T                                # (B, A)
    log_prob = out[A, :B]                                 # (B,)
    return action, log_prob


# -------------------------- deterministic params --------------------------- #
def init_params(key, state_dim, action_dim, num_layers, hidden_dim):
    """PyTorch-Linear-style uniform(-1/sqrt(fan_in), 1/sqrt(fan_in)) init."""
    def linear(k, fan_in, fan_out):
        kw, kb = jax.random.split(k)
        bound = 1.0 / math.sqrt(fan_in)
        w = jax.random.uniform(kw, (fan_in, fan_out), jnp.float32, -bound, bound)
        b = jax.random.uniform(kb, (1, fan_out), jnp.float32, -bound, bound)
        return w, b

    keys = jax.random.split(key, 3 + num_layers)
    w1, b1 = linear(keys[0], state_dim, hidden_dim)
    whs, bhs = [], []
    for i in range(num_layers):
        w, b = linear(keys[1 + i], hidden_dim, hidden_dim)
        whs.append(w)
        bhs.append(b)
    w_hidden = (jnp.stack(whs) if num_layers > 0
                else jnp.zeros((0, hidden_dim, hidden_dim), jnp.float32))
    b_hidden = (jnp.stack(bhs) if num_layers > 0
                else jnp.zeros((0, 1, hidden_dim), jnp.float32))
    w_mu, b_mu = linear(keys[1 + num_layers], hidden_dim, action_dim)
    w_ls, b_ls = linear(keys[2 + num_layers], hidden_dim, action_dim)
    return dict(w1=w1, b1=b1, w_hidden=w_hidden, b_hidden=b_hidden,
                w_mu=w_mu, b_mu=b_mu, w_ls=w_ls, b_ls=b_ls)


# ---------------------------- pure-JAX reference --------------------------- #
def actor_reference(x, params, eps, *, num_layers, matmul_dtype=jnp.bfloat16):
    """Mirrors the kernel math (bf16 matmuls, stable tanh log-det)."""
    B = x.shape[0]
    x = x.reshape(B, -1)

    def mm(a, w):
        return jnp.dot(a.astype(matmul_dtype), w.astype(matmul_dtype),
                       preferred_element_type=jnp.float32)

    h = jnp.maximum(mm(x, params["w1"]) + params["b1"], 0.0)
    for i in range(num_layers):
        h = jnp.maximum(mm(h, params["w_hidden"][i]) + params["b_hidden"][i], 0.0)
    mu = mm(h, params["w_mu"]) + params["b_mu"]
    log_std = jnp.clip(mm(h, params["w_ls"]) + params["b_ls"], -20.0, 2.0)
    std = jnp.exp(log_std)
    z = mu + std * eps
    lp = -0.5 * eps * eps - log_std - 0.5 * math.log(2.0 * math.pi)
    log_prob = jnp.sum(lp, axis=-1)
    action = jnp.tanh(z)
    t = -2.0 * z
    log1m_tanh2 = 2.0 * (math.log(2.0) - z
                         - (jnp.maximum(t, 0.0) + jnp.log1p(jnp.exp(-jnp.abs(t)))))
    log_prob = log_prob - jnp.sum(log1m_tanh2, axis=-1)
    return action, log_prob


# ---------------------------------- main ----------------------------------- #
if __name__ == "__main__":
    STATE_DIM, ACTION_DIM = 16, 8
    NUM_LAYERS, HIDDEN_DIM = 2, 32
    BATCH = 4

    key = jax.random.PRNGKey(0)
    k_param, k_x, k_eps = jax.random.split(key, 3)

    params = init_params(k_param, STATE_DIM, ACTION_DIM, NUM_LAYERS, HIDDEN_DIM)
    x = jax.random.normal(k_x, (BATCH, STATE_DIM), jnp.float32)
    eps = jax.random.normal(k_eps, (BATCH, ACTION_DIM), jnp.float32)

    action, log_prob = actor_forward(x, params, eps, num_layers=NUM_LAYERS)
    jax.block_until_ready((action, log_prob))

    ref_action, ref_log_prob = actor_reference(x, params, eps, num_layers=NUM_LAYERS)
    assert action.shape == (BATCH, ACTION_DIM) and log_prob.shape == (BATCH,)
    assert jnp.allclose(action, ref_action, atol=1e-2), "action mismatch"
    assert jnp.allclose(log_prob, ref_log_prob, atol=5e-2), "log_prob mismatch"

    print("KERNEL_OK")
</pallas_src>

<mosaic_0001>
module attributes {stable_mosaic.version = 11 : i64} {
  func.func @_actor_kernel(%arg0: i32, %arg1: memref<16x128xbf16, #tpu.memory_space<vmem>>, %arg2: memref<32x16xbf16, #tpu.memory_space<vmem>>, %arg3: memref<3x32x1xf32, #tpu.memory_space<vmem>>, %arg4: memref<2x32x32xbf16, #tpu.memory_space<vmem>>, %arg5: memref<16x32xbf16, #tpu.memory_space<vmem>>, %arg6: memref<16x1xf32, #tpu.memory_space<vmem>>, %arg7: memref<8x128xf32, #tpu.memory_space<vmem>>, %arg8: memref<9x128xf32, #tpu.memory_space<vmem>>) attributes {dimension_semantics = [#tpu.dimension_semantics<parallel>], iteration_bounds = array<i64: 2>, scalar_prefetch = 0 : i64, scratch_operands = 0 : i64, tpu.core_type = #tpu.core_type<tc>, window_params = [{transform_indices = @transform_0, window_bounds = array<i64: 16, 128>}, {pipeline_mode = #tpu.pipeline_mode<synchronous>, transform_indices = @transform_1, window_bounds = array<i64: 32, 16>}, {pipeline_mode = #tpu.pipeline_mode<synchronous>, transform_indices = @transform_2, window_bounds = array<i64: 3, 32, 1>}, {pipeline_mode = #tpu.pipeline_mode<synchronous>, transform_indices = @transform_3, window_bounds = array<i64: 2, 32, 32>}, {pipeline_mode = #tpu.pipeline_mode<synchronous>, transform_indices = @transform_4, window_bounds = array<i64: 16, 32>}, {pipeline_mode = #tpu.pipeline_mode<synchronous>, transform_indices = @transform_5, window_bounds = array<i64: 16, 1>}, {transform_indices = @transform_6, window_bounds = array<i64: 8, 128>}, {transform_indices = @transform_7, window_bounds = array<i64: 9, 128>}]} {
    %c0 = arith.constant 0 : index
    %c0_0 = arith.constant 0 : index
    %0 = vector.load %arg2[%c0, %c0_0] : memref<32x16xbf16, #tpu.memory_space<vmem>>, vector<32x16xbf16>
    %c0_1 = arith.constant 0 : index
    %c0_2 = arith.constant 0 : index
    %1 = vector.load %arg1[%c0_1, %c0_2] : memref<16x128xbf16, #tpu.memory_space<vmem>>, vector<16x128xbf16>
    %cst = arith.constant dense<0.000000e+00> : vector<32x128xf32>
    %2 = tpu.matmul %0, %1, %cst {dimension_numbers = #tpu.dot_dimension_numbers<[1], [0], [0], [1], [0, 0, 1, 1], [], []>} : vector<32x16xbf16>, vector<16x128xbf16>, vector<32x128xf32> -> vector<32x128xf32>
    %c0_3 = arith.constant 0 : index
    %c0_4 = arith.constant 0 : index
    %c0_5 = arith.constant 0 : index
    %3 = vector.load %arg3[%c0_3, %c0_4, %c0_5] : memref<3x32x1xf32, #tpu.memory_space<vmem>>, vector<1x32x1xf32>
    %4 = vector.shape_cast %3 : vector<1x32x1xf32> to vector<32x1xf32>
    %5 = vector.broadcast %4 : vector<32x1xf32> to vector<32x128xf32>
    %6 = arith.addf %2, %5 : vector<32x128xf32>
    %cst_6 = arith.constant 0.000000e+00 : f32
    %7 = vector.broadcast %cst_6 : f32 to vector<32x128xf32>
    %8 = arith.maximumf %6, %7 : vector<32x128xf32>
    %c0_7 = arith.constant 0 : index
    %c0_8 = arith.constant 0 : index
    %c0_9 = arith.constant 0 : index
    %9 = vector.load %arg4[%c0_7, %c0_8, %c0_9] : memref<2x32x32xbf16, #tpu.memory_space<vmem>>, vector<1x32x32xbf16>
    %10 = vector.shape_cast %9 : vector<1x32x32xbf16> to vector<32x32xbf16>
    %11 = arith.truncf %8 : vector<32x128xf32> to vector<32x128xbf16>
    %cst_10 = arith.constant dense<0.000000e+00> : vector<32x128xf32>
    %12 = tpu.matmul %10, %11, %cst_10 {dimension_numbers = #tpu.dot_dimension_numbers<[1], [0], [0], [1], [0, 0, 1, 1], [], []>} : vector<32x32xbf16>, vector<32x128xbf16>, vector<32x128xf32> -> vector<32x128xf32>
    %c1 = arith.constant 1 : index
    %c0_11 = arith.constant 0 : index
    %c0_12 = arith.constant 0 : index
    %13 = vector.load %arg3[%c1, %c0_11, %c0_12] : memref<3x32x1xf32, #tpu.memory_space<vmem>>, vector<1x32x1xf32>
    %14 = vector.shape_cast %13 : vector<1x32x1xf32> to vector<32x1xf32>
    %15 = vector.broadcast %14 : vector<32x1xf32> to vector<32x128xf32>
    %16 = arith.addf %12, %15 : vector<32x128xf32>
    %cst_13 = arith.constant 0.000000e+00 : f32
    %17 = vector.broadcast %cst_13 : f32 to vector<32x128xf32>
    %18 = arith.maximumf %16, %17 : vector<32x128xf32>
    %c1_14 = arith.constant 1 : index
    %c0_15 = arith.constant 0 : index
    %c0_16 = arith.constant 0 : index
    %19 = vector.load %arg4[%c1_14, %c0_15, %c0_16] : memref<2x32x32xbf16, #tpu.memory_space<vmem>>, vector<1x32x32xbf16>
    %20 = vector.shape_cast %19 : vector<1x32x32xbf16> to vector<32x32xbf16>
    %21 = arith.truncf %18 : vector<32x128xf32> to vector<32x128xbf16>
    %cst_17 = arith.constant dense<0.000000e+00> : vector<32x128xf32>
    %22 = tpu.matmul %20, %21, %cst_17 {dimension_numbers = #tpu.dot_dimension_numbers<[1], [0], [0], [1], [0, 0, 1, 1], [], []>} : vector<32x32xbf16>, vector<32x128xbf16>, vector<32x128xf32> -> vector<32x128xf32>
    %c2 = arith.constant 2 : index
    %c0_18 = arith.constant 0 : index
    %c0_19 = arith.constant 0 : index
    %23 = vector.load %arg3[%c2, %c0_18, %c0_19] : memref<3x32x1xf32, #tpu.memory_space<vmem>>, vector<1x32x1xf32>
    %24 = vector.shape_cast %23 : vector<1x32x1xf32> to vector<32x1xf32>
    %25 = vector.broadcast %24 : vector<32x1xf32> to vector<32x128xf32>
    %26 = arith.addf %22, %25 : vector<32x128xf32>
    %cst_20 = arith.constant 0.000000e+00 : f32
    %27 = vector.broadcast %cst_20 : f32 to vector<32x128xf32>
    %28 = arith.maximumf %26, %27 : vector<32x128xf32>
    %c0_21 = arith.constant 0 : index
    %c0_22 = arith.constant 0 : index
    %29 = vector.load %arg5[%c0_21, %c0_22] : memref<16x32xbf16, #tpu.memory_space<vmem>>, vector<16x32xbf16>
    %30 = arith.truncf %28 : vector<32x128xf32> to vector<32x128xbf16>
    %cst_23 = arith.constant dense<0.000000e+00> : vector<16x128xf32>
    %31 = tpu.matmul %29, %30, %cst_23 {dimension_numbers = #tpu.dot_dimension_numbers<[1], [0], [0], [1], [0, 0, 1, 1], [], []>} : vector<16x32xbf16>, vector<32x128xbf16>, vector<16x128xf32> -> vector<16x128xf32>
    %c0_24 = arith.constant 0 : index
    %c0_25 = arith.constant 0 : index
    %32 = vector.load %arg6[%c0_24, %c0_25] : memref<16x1xf32, #tpu.memory_space<vmem>>, vector<16x1xf32>
    %33 = vector.broadcast %32 : vector<16x1xf32> to vector<16x128xf32>
    %34 = arith.addf %31, %33 : vector<16x128xf32>
    %35 = vector.extract_strided_slice %34 {offsets = [0, 0], sizes = [8, 128], strides = [1, 1]} : vector<16x128xf32> to vector<8x128xf32>
    %36 = vector.extract_strided_slice %34 {offsets = [8, 0], sizes = [8, 128], strides = [1, 1]} : vector<16x128xf32> to vector<8x128xf32>
    %cst_26 = arith.constant -2.000000e+01 : f32
    %cst_27 = arith.constant 2.000000e+00 : f32
    %37 = vector.broadcast %cst_26 : f32 to vector<8x128xf32>
    %38 = arith.maximumf %37, %36 : vector<8x128xf32>
    %39 = vector.broadcast %cst_27 : f32 to vector<8x128xf32>
    %40 = arith.minimumf %39, %38 : vector<8x128xf32>
    %41 = math.exp %40 : vector<8x128xf32>
    %c0_28 = arith.constant 0 : index
    %c0_29 = arith.constant 0 : index
    %42 = vector.load %arg7[%c0_28, %c0_29] : memref<8x128xf32, #tpu.memory_space<vmem>>, vector<8x128xf32>
    %43 = arith.mulf %41, %42 : vector<8x128xf32>
    %44 = arith.addf %35, %43 : vector<8x128xf32>
    %cst_30 = arith.constant -5.000000e-01 : f32
    %45 = vector.broadcast %cst_30 : f32 to vector<8x128xf32>
    %46 = arith.mulf %45, %42 : vector<8x128xf32>
    %47 = arith.mulf %46, %42 : vector<8x128xf32>
    %48 = arith.subf %47, %40 : vector<8x128xf32>
    %cst_31 = arith.constant 0.918938517 : f32
    %49 = vector.broadcast %cst_31 : f32 to vector<8x128xf32>
    %50 = arith.subf %48, %49 : vector<8x128xf32>
    %51 = math.tanh %44 : vector<8x128xf32>
    %cst_32 = arith.constant -2.000000e+00 : f32
    %52 = vector.broadcast %cst_32 : f32 to vector<8x128xf32>
    %53 = arith.mulf %52, %44 : vector<8x128xf32>
    %cst_33 = arith.constant 0.000000e+00 : f32
    %54 = vector.broadcast %cst_33 : f32 to vector<8x128xf32>
    %55 = arith.maximumf %53, %54 : vector<8x128xf32>
    %56 = math.absf %53 : vector<8x128xf32>
    %cst_34 = arith.constant 0.000000e+00 : f32
    %57 = vector.broadcast %cst_34 : f32 to vector<8x128xf32>
    %58 = arith.subf %57, %56 : vector<8x128xf32>
    %59 = math.exp %58 : vector<8x128xf32>
    %cst_35 = arith.constant 1.000000e+00 : f32
    %60 = vector.broadcast %cst_35 : f32 to vector<8x128xf32>
    %61 = arith.addf %60, %59 : vector<8x128xf32>
    %62 = math.log %61 : vector<8x128xf32>
    %63 = arith.addf %55, %62 : vector<8x128xf32>
    %cst_36 = arith.constant 0.693147182 : f32
    %64 = vector.broadcast %cst_36 : f32 to vector<8x128xf32>
    %65 = arith.subf %64, %44 : vector<8x128xf32>
    %66 = arith.subf %65, %63 : vector<8x128xf32>
    %cst_37 = arith.constant 2.000000e+00 : f32
    %67 = vector.broadcast %cst_37 : f32 to vector<8x128xf32>
    %68 = arith.mulf %67, %66 : vector<8x128xf32>
    %69 = arith.subf %50, %68 : vector<8x128xf32>
    %cst_38 = arith.constant dense<0.000000e+00> : vector<128xf32>
    %70 = vector.multi_reduction <add>, %69, %cst_38 [0] : vector<8x128xf32> to vector<128xf32>
    %71 = vector.shape_cast %70 : vector<128xf32> to vector<1x128xf32>
    %72 = tpu.concatenate %51, %71 in 0 : vector<8x128xf32>, vector<1x128xf32> -> vector<9x128xf32>
    %c0_39 = arith.constant 0 : index
    %c0_40 = arith.constant 0 : index
    %73 = vector.load %arg8[%c0_39, %c0_40] : memref<9x128xf32, #tpu.memory_space<vmem>>, vector<9x128xf32>
    tpu.vector_store %arg8[%c0_39, %c0_40], %72 {strides = array<i32>} : memref<9x128xf32, #tpu.memory_space<vmem>>, vector<9x128xf32>,
    return
  }
  func.func @transform_0(%arg0: i32) -> (i32, i32) {
    %c0_i32 = arith.constant 0 : i32
    %c0_i32_0 = arith.constant 0 : i32
    return %c0_i32, %arg0 : i32, i32
  }
  func.func @transform_1(%arg0: i32) -> (i32, i32) {
    %c0_i32 = arith.constant 0 : i32
    %c0_i32_0 = arith.constant 0 : i32
    %c0_i32_1 = arith.constant 0 : i32
    return %c0_i32, %c0_i32_0 : i32, i32
  }
  func.func @transform_2(%arg0: i32) -> (i32, i32, i32) {
    %c0_i32 = arith.constant 0 : i32
    %c0_i32_0 = arith.constant 0 : i32
    %c0_i32_1 = arith.constant 0 : i32
    %c0_i32_2 = arith.constant 0 : i32
    return %c0_i32, %c0_i32_0, %c0_i32_1 : i32, i32, i32
  }
  func.func @transform_3(%arg0: i32) -> (i32, i32, i32) {
    %c0_i32 = arith.constant 0 : i32
    %c0_i32_0 = arith.constant 0 : i32
    %c0_i32_1 = arith.constant 0 : i32
    %c0_i32_2 = arith.constant 0 : i32
    return %c0_i32, %c0_i32_0, %c0_i32_1 : i32, i32, i32
  }
  func.func @transform_4(%arg0: i32) -> (i32, i32) {
    %c0_i32 = arith.constant 0 : i32
    %c0_i32_0 = arith.constant 0 : i32
    %c0_i32_1 = arith.constant 0 : i32
    return %c0_i32, %c0_i32_0 : i32, i32
  }
  func.func @transform_5(%arg0: i32) -> (i32, i32) {
    %c0_i32 = arith.constant 0 : i32
    %c0_i32_0 = arith.constant 0 : i32
    %c0_i32_1 = arith.constant 0 : i32
    return %c0_i32, %c0_i32_0 : i32, i32
  }
  func.func @transform_6(%arg0: i32) -> (i32, i32) {
    %c0_i32 = arith.constant 0 : i32
    %c0_i32_0 = arith.constant 0 : i32
    return %c0_i32, %arg0 : i32, i32
  }
  func.func @transform_7(%arg0: i32) -> (i32, i32) {
    %c0_i32 = arith.constant 0 : i32
    %c0_i32_0 = arith.constant 0 : i32
    return %c0_i32, %arg0 : i32, i32
  }
}

</mosaic_0001>

<bundles_post_ra>
// kernel: tpu_custom_call.1
= control target key start
LH: loop header
LB: loop body
LE: loop exit
PB: predicated region body
PF: predicated region fallthrough
CT: control target
= control target key end

     0   :  { %12 = vsyncpa [#allocation4], 0  ;;  %s1286_s0 = inlined_call_operand.vmem [shape: bf16[16,256], index: 0, kind: input, shape index: {}]   ;;  %s1287_s1 = inlined_call_operand.vmem [shape: bf16[32,16], index: 1, kind: input, shape index: {}]   ;;  %s1288_s2 = inlined_call_operand.vmem [shape: f32[3,32,1], index: 2, kind: input, shape index: {}]   ;;  %s1289_s3 = inlined_call_operand.vmem [shape: bf16[2,32,32], index: 3, kind: input, shape index: {}]   ;;  %s1290_s4 = inlined_call_operand.vmem [shape: bf16[16,32], index: 4, kind: input, shape index: {}]   ;;  %s1291_s5 = inlined_call_operand.vmem [shape: f32[16,1], index: 5, kind: input, shape index: {}]   ;;  %s1292_s6 = inlined_call_operand.vmem [shape: f32[8,256], index: 6, kind: input, shape index: {}]   ;;  %s1293_s7 = inlined_call_operand.hbm [shape: f32[9,256], index: 7, kind: output, shape index: {}]  }
   0x1   :  { %14 = vsyncpa [#allocation4 + $0x1], 0  ;;  %s1099_s24 = smov 0   ;;  %s1101_s25 = smov 0  }
   0x2   :  { %s1103_s26 = smov 0   ;;  %s1105_s27 = smov 0  }
   0x3 LB: > { %s1120_s28 = sadd.s32 4294967295, %s1050_s27   ;;  %s840_s29 = sadd.s32 4294967294, %s1050_s27   ;;  %s1050_s27 = sphi %s1105_s27, %s1299_s27   ;;  %s1046_s26 = sphi %s1103_s26, %s1298_s26   ;;  %s1042_s25 = sphi %s1101_s25, %s1297_s25   ;;  %s1038_s24 = sphi %s1099_s24, %s1296_s24  }
   0x4   : > { %s1124_s30 = sadd.s32 1, %s1050_s27   ;;  %s27_s8 = sadd.s32 1, %s1046_s26 }
   0x5   : > { %s24_s9 = ssub.s32 %s1050_s27, %s1124_s30  ;;  %p34_p0 = scmp.ne.s32.totalorder %s1046_s26, %s1042_s25 }
   0x6   : > { %p25_p1 = scmp.eq.s32.totalorder %s24_s9, 0  ;;  %p35_p2 = scmp.eq.s32.totalorder %s1050_s27, 0 }
   0x7   : > { %p195_p3 = scmp.eq.s32.totalorder %s1120_s28, 1  ;;  %p200_p4 = scmp.ne.s32.totalorder %s1042_s25, %s1038_s24 }
   0x8   : > { %s1136_s10 = scalar_select %p25_p1, %s1046_s26, %s27_s8  }
   0x9   : > { %p36_p5 = por %p35_p2, %p34_p0  ;;  %p1138_p6 = por %p195_p3, %p34_p0 }
   0xa   : > { %p201_p7 = scmp.eq.s32.totalorder %s840_s29, 1  ;;  %p842_p9 = scmp.ge.s32.totalorder %s1050_s27, 2 }
   0xc   : > { %p1142_p8 = por %p201_p7, %p200_p4  ;;  %232 = sbr.rel (%p842_p9) target bundleno = 26 (0x1a), region = 36 }
  0x13   : > { %235 = sbr.rel (!%p36_p5) target bundleno = 26 (0x1a), region = 40  ;;  %s237_s13 = sand.u32 (%p36_p5), 1, %s1046_s26  }
  0x14   : > { %s844_s14 = sshll.u32 (%p36_p5), %s1050_s27, 2  ;;  %s843_s15 = sshll.u32 (%p36_p5), %s237_s13, 3 }
  0x15   : > { %s241_s18 = scalar_lea.vmem (%p36_p5), %s1286_s0, %s844_s14  ;;  %s239_s19 = scalar_lea.vmem (%p36_p5), [#allocation2], %s843_s15 }
  0x16   : > { %v257_v0 = vld [vmem:[%s241_s18] sm:$0xf] (%p36_p5)  ;;  %v259_v1 = vld [vmem:[%s241_s18 + $0x8] sm:$0xf] (%p36_p5) }
  0x17   : > { %258 = vst [vmem:[%s239_s19] sm:$0xf] (%p36_p5), %v257_v0  ;;  %260 = vst [vmem:[%s239_s19 + $0x4] sm:$0xf] (%p36_p5), %v259_v1 }
  0x1a PF: > { %p845_p10 = scmp.ge.s32.totalorder %s1050_s27, 1  ;;  %p293_p11 = scmp.lt.s32.totalorder %s1050_s27, 3 }
  0x1c   : > { %p294_p12 = pnand %p845_p10, %p293_p11 }
  0x1d   : > { %s1157_s20 = sand.u32 (!%p294_p12), 1, %s1042_s25   ;;  %v973_v2 = vld [vmem:[%s1287_s1] sm:$0xff] (!%p294_p12)   ;;  %vm386_vm0 = vcmask (!%p294_p12), 130048   ;;  %v1052_v5 = vmov (!%p294_p12), 0   ;;  %v348_v6 = vld [vmem:[%s1288_s2 + $0x10] sm:$0xff] (!%p294_p12)  ;;  %v974_v7 = vld [vmem:[%s1287_s1 + $0x8] sm:$0xff] (!%p294_p12)  }
  0x1e   : > { %297 = sbr.rel (%p294_p12) target bundleno = 1030 (0x406), region = 85  ;;  %s846_s23 = sshll.u32 (!%p294_p12), %s1157_s20, 3  ;;  %897 = vmatprep.mubr.msk.bf16.mxu0 (!%p294_p12), %vm386_vm0, %v973_v2  ;;  %v346_v3 = vld [vmem:[%s1288_s2] sm:$0xff] (!%p294_p12)  ;;  %970 = vset.pattern.permute.xlu0 (!%p294_p12), %v1052_v5  ;;  %v347_v8 = vld [vmem:[%s1288_s2 + $0x8] sm:$0xff] (!%p294_p12)  ;;  %v349_v9 = vld [vmem:[%s1288_s2 + $0x18] sm:$0xff] (!%p294_p12)  ;;  %vm487_vm1 = vcmask (!%p294_p12), 261120  }
  0x1f   : > { %s302_s9 = scalar_lea.vmem (!%p294_p12), [#allocation2], %s846_s23  ;;  %971 = vset.pattern.permute.xlu1 (!%p294_p12), %v1052_v5  ;;  %352 = vperm.xlu0 (!%p294_p12), %970, %v346_v3   ;;  %v854_v10 = vld [vmem:[%s1288_s2 + $0x20] sm:$0xff] (!%p294_p12)  ;;  %v855_v11 = vld [vmem:[%s1288_s2 + $0x28] sm:$0xff] (!%p294_p12)  ;;  %v856_v12 = vld [vmem:[%s1288_s2 + $0x30] sm:$0xff] (!%p294_p12)  ;;  %v1053_v60 = vmov (!%p294_p12), 0.0   ;;  %vm1054_vm2 = vmmov (!%p294_p12), 0  }
  0x20   : > { %v972_v4 = vld [vmem:[%s302_s9] sm:$0xff] (!%p294_p12)   ;;  %362 = vperm.xlu1 (!%p294_p12), %971, %v348_v6   ;;  %v857_v13 = vld [vmem:[%s1288_s2 + $0x38] sm:$0xff] (!%p294_p12)  ;;  %v868_v16 = vld [vmem:[%s1288_s2 + $0x50] sm:$0xff] (!%p294_p12)  ;;  %p335_p13 = scmp.lt.s32.totalorder (!%p294_p12), %s1120_s28, 1  ;;  %s847_s17 = sshll.u32 (!%p294_p12), %s1157_s20, 4 }
  0x21   : > { %895 = vmatprep.subr.bf16.mxu0 (!%p294_p12), %v972_v4  ;;  %v866_v14 = vld [vmem:[%s1288_s2 + $0x40] sm:$0xff] (!%p294_p12)  ;;  %v867_v15 = vld [vmem:[%s1288_s2 + $0x48] sm:$0xff] (!%p294_p12)  ;;  %v869_v17 = vld [vmem:[%s1288_s2 + $0x58] sm:$0xff] (!%p294_p12)  ;;  %s334_s18 = scalar_lea.vmem (!%p294_p12), [#allocation3], %s847_s17  ;;  %s878_s21 = sshll.u32 (!%p294_p12), %s1120_s28, 7 }
  0x22   : > { %896 = vmatpush3.bf16.msra.mxu0 (!%p294_p12), %v972_v4  ;;  %v653_v18 = vld [vmem:[%s1291_s5 + $0x8] sm:$0xff] (!%p294_p12)  ;;  %v652_v19 = vld [vmem:[%s1291_s5] sm:$0xff] (!%p294_p12)  ;;  %v977_v40 = vld [vmem:[%s1289_s3 + $0x10] sm:$0xff] (!%p294_p12)   ;;  %s760_s19 = sshll.u32 (!%p294_p12), %s334_s18, 4  ;;  %s1242_s29 = scalar_lea.hbm (!%p294_p12), %s1293_s7, %s878_s21  ;;  %s1237_s19 = int_to_ptr.vmem [resolvable:$true] %s760_s19 }
  0x23   : > { %357 = vperm.xlu0 (!%p294_p12), %970, %v347_v8   ;;  %v975_v20 = vld [vmem:[%s1289_s3] sm:$0xff] (!%p294_p12)   ;;  %v976_v39 = vld [vmem:[%s1289_s3 + $0x8] sm:$0xff] (!%p294_p12)   ;;  %v978_v59 = vld [vmem:[%s1289_s3 + $0x18] sm:$0xff] (!%p294_p12)   ;;  %s748_s8 = scalar_lea.sflag (!%p294_p12), [#allocation4], %s1157_s20 }
  0x24   : > { %367 = vperm.xlu1 (!%p294_p12), %971, %v349_v9   ;;  %905 = vmatprep.mubr.msk.bf16.mxu1 (!%p294_p12), %vm487_vm1, %v975_v20 }
  0x25   : > { %898 = vmatmul.mubr.msk.bf16.vlgmr.msra.gmra.mrb[0].mxu0 %vm386_vm0, %v974_v7  ;;  %s336_s9 = scalar_select %p335_p13, %s1120_s28, 1 }
  0x26   : > { %913 = vmatprep.mubr.msk.bf16.mxu0 %vm487_vm1, %v977_v40  ;;  %s1055_s28 = smov [#allocation3]  }
  0x27   : > { %459 = vperm.xlu0 %970, %v854_v10   ;;  %s848_s13 = sshll.u32 %s336_s9, 3  ;;  %s988_s9 = scalar_lea.vmem %s1237_s19, 256 }
  0x28   : > { %464 = vperm.xlu1 %971, %v855_v11   ;;  %s338_s16 = scalar_lea.vmem %s1292_s6, %s848_s13  ;;  %p989_p0 = scmp.ne.s32.totalorder %s1237_s19, %s988_s9 }
  0x29   : > { %s992_s13 = sshll.u32 %s1055_s28, 4  ;;  %s993_s13 = int_to_ptr.vmem [resolvable:$false] %s992_s13 }
  0x2a   : > { %p990_p1 = pnand %p989_p0, %p1138_p6  ;;  %s994_s14 = scalar_lea.vmem %s993_s13, 512 }
  0x2b   : > { %469 = vperm.xlu0 %970, %v856_v12   ;;  %p995_p3 = scmp.lt.s32.totalorder %s1237_s19, %s993_s13  ;;  %p996_p4 = scmp.lt.s32.totalorder %s994_s14, %s988_s9 }
  0x2c   : > { %474 = vperm.xlu1 %971, %v857_v13   ;;  %p991_p2 = pneg %p990_p1 }
  0x2d   : > { %p997_p5 = por %p996_p4, %p995_p3 }
  0x2f   : > { %561 = vperm.xlu0 %970, %v866_v14   ;;  %p998_p7 = pnand %p997_p5, %p991_p2 }
  0x30   : > { %566 = vperm.xlu1 %971, %v867_v15   ;;  %v979_v15 = vld [vmem:[%s1290_s4] sm:$0xff]  }
  0x33   : > { %571 = vperm.xlu0 %970, %v868_v16  }
  0x34   : > { %576 = vperm.xlu1 %971, %v869_v17  }
  0x37   : > { %661 = vperm.xlu0 %970, %v653_v18  }
  0x38   : > { %656 = vperm.xlu1 %971, %v652_v19  }
  0x9e   : > { %v353_v22 = vpop.permute.xlu0 %352 }
  0x9f   : > { %v363_v21 = vpop.permute.xlu1 %362 }
  0xa2   : > { %v358_v29 = vpop.permute.xlu0 %357 }
  0xa3   : > { %v368_v26 = vpop.permute.xlu1 %367 }
  0xa6   : > { %v460_v41 = vpop.permute.xlu0 %459 }
  0xa7   : > { %v465_v42 = vpop.permute.xlu1 %464 }
  0xaa   : > { %v470_v43 = vpop.permute.xlu0 %469 }
  0xab   : > { %v475_v47 = vpop.permute.xlu1 %474 }
  0xae   : > { %v562_v61 = vpop.permute.xlu0 %561 }
  0xaf   : > { %v567_v62 = vpop.permute.xlu1 %566 }
  0xb2   : > { %v572_v63 = vpop.permute.xlu0 %571 }
  0xb3   : > { %v577_v3 = vpop.permute.xlu1 %576 }
  0xb6   : > { %v662_v18 = vpop.permute.xlu0 %661 }
  0xf8   : > { %v899_v23 = vpop.f32.mrb[0].mxu0 }
  0xf9   : > { %v436_v24 = vadd.f32 %v899_v23, %v363_v21  ;;  %v427_v25 = vpop.f32.mrb[1].mxu0 }
  0xfa   : > { %v428_v27 = vadd.f32 %v427_v25, %v353_v22  ;;  %v900_v28 = vpop.f32.mrb[2].mxu0 }
  0xfb   : > { %v439_v30 = vadd.f32 %v900_v28, %v368_v26  ;;  %v430_v31 = vpop.f32.mrb[3].mxu0  ;;  %v444_v33 = vmax.f32 %v436_v24, 0.0  ;;  %v657_v26 = vpop.permute.xlu1 %656 }
  0xfc   : > { %v431_v32 = vadd.f32 %v430_v31, %v358_v29  ;;  %v442_v35 = vmax.f32 %v428_v27, 0.0  ;;  %v717_v27 = vld [vmem:[%s338_s16] sm:$0xff] }
  0xfd   : > { %v445_v34 = vmax.f32 %v439_v30, 0.0 }
  0xfe   : > { %v443_v36 = vmax.f32 %v431_v32, 0.0 }
  0xff   : > { %v451_v37 = vpack.c.bf16 %v445_v34, %v444_v33 }
 0x100   : > { %v450_v38 = vpack.c.bf16 %v443_v36, %v442_v35 }
 0x102   : > { %901 = vmatprep.subr.bf16.mxu1 %v450_v38 }
 0x103   : > { %902 = vmatpush3.bf16.msra.mxu1 %v450_v38  ;;  %v720_v38 = vmul.f32 -0.5, %v717_v27 }
 0x104   : > { %903 = vmatprep.subr.bf16.mxu1 %v451_v37 }
 0x107   : > { %904 = vmatpush3.bf16.msra.mxu1 %v451_v37 }
 0x108   : > { %917 = vmatprep.subr.bf16.mxu1 %v1053_v60 }
 0x10a   : > { %906 = vmatmul.mubr.msk.bf16.vlgmr.msra.gmra.mrb[0].mxu1 %vm487_vm1, %v976_v39  ;;  %v721_v39 = vmul.f32 %v720_v38, %v717_v27 }
 0x10b   : > { %921 = vmatprep.mubr.msk.bf16.mxu1 %vm1054_vm2, %v1053_v60 }
 0x1dd   : > { %v907_v44 = vpop.f32.mrb[0].mxu1 }
 0x1de   : > { %v537_v45 = vadd.f32 %v907_v44, %v470_v43  ;;  %v528_v46 = vpop.f32.mrb[1].mxu1 }
 0x1df   : > { %v529_v48 = vadd.f32 %v528_v46, %v460_v41  ;;  %v908_v49 = vpop.f32.mrb[2].mxu1 }
 0x1e0   : > { %v540_v50 = vadd.f32 %v908_v49, %v475_v47  ;;  %v531_v51 = vpop.f32.mrb[3].mxu1  ;;  %v545_v53 = vmax.f32 %v537_v45, 0.0 }
 0x1e1   : > { %v532_v52 = vadd.f32 %v531_v51, %v465_v42  ;;  %v543_v55 = vmax.f32 %v529_v48, 0.0 }
 0x1e2   : > { %v546_v54 = vmax.f32 %v540_v50, 0.0 }
 0x1e3   : > { %v544_v56 = vmax.f32 %v532_v52, 0.0 }
 0x1e4   : > { %v553_v57 = vpack.c.bf16 %v546_v54, %v545_v53 }
 0x1e5   : > { %v552_v58 = vpack.c.bf16 %v544_v56, %v543_v55 }
 0x1e7   : > { %909 = vmatprep.subr.bf16.mxu0 %v552_v58 }
 0x1e8   : > { %910 = vmatpush3.bf16.msra.mxu0 %v552_v58 }
 0x1e9   : > { %911 = vmatprep.subr.bf16.mxu0 %v553_v57 }
 0x1ec   : > { %912 = vmatpush3.bf16.msra.mxu0 %v553_v57 }
 0x1ef   : > { %914 = vmatmul.mubr.msk.bf16.vlgmr.msra.gmra.mrb[4].mxu0 %vm487_vm1, %v978_v59 }
 0x2c2   : > { %v915_v0 = vpop.f32.mrb[4].mxu0 }
 0x2c3   : > { %v638_v1 = vadd.f32 %v915_v0, %v572_v63  ;;  %v629_v2 = vpop.f32.mrb[5].mxu0 }
 0x2c4   : > { %v630_v4 = vadd.f32 %v629_v2, %v562_v61  ;;  %v916_v5 = vpop.f32.mrb[6].mxu0 }
 0x2c5   : > { %v641_v6 = vadd.f32 %v916_v5, %v577_v3  ;;  %v632_v7 = vpop.f32.mrb[7].mxu0  ;;  %v646_v9 = vmax.f32 %v638_v1, 0.0 }
 0x2c6   : > { %v633_v8 = vadd.f32 %v632_v7, %v567_v62  ;;  %v644_v11 = vmax.f32 %v630_v4, 0.0 }
 0x2c7   : > { %v647_v10 = vmax.f32 %v641_v6, 0.0 }
 0x2c8   : > { %v645_v12 = vmax.f32 %v633_v8, 0.0 }
 0x2c9   : > { %v651_v13 = vpack.c.bf16 %v647_v10, %v646_v9 }
 0x2ca   : > { %v650_v14 = vpack.c.bf16 %v645_v12, %v644_v11 }
 0x2cc   : > { %918 = vmatpush3.bf16.msra.mxu1 %v650_v14 }
 0x2cd   : > { %919 = vmatprep.subr.bf16.mxu1 %v1053_v60 }
 0x2d0   : > { %920 = vmatpush3.bf16.msra.mxu1 %v651_v13 }
 0x2d3   : > { %922 = vmatmul.mubr.msk.bf16.vlgmr.msra.gmra.mrb[4].mxu1 %vm487_vm1, %v979_v15 }
 0x3a6   : > { %v706_v16 = vpop.f32.mrb[4].mxu1 }
 0x3a7   : > { %v923_v17 = vpop.f32.mrb[5].mxu1  ;;  %v707_v28 = vadd.f32 %v706_v16, %v657_v26 }
 0x3a8   : > { %v709_v19 = vpop.f32.mrb[6].mxu1 }
 0x3a9   : > { %v710_v20 = vadd.f32 %v709_v19, %v662_v18  ;;  %v924_v21 = vpop.f32.mrb[7].mxu1 }
 0x3ab   : > { %v713_v22 = vmax.f32 %v710_v20, -20.0 }
 0x3ad   : > { %v714_v23 = vmin.f32 %v713_v22, 2.0 }
 0x3af   : > { %v715_v24 = vmul.f32 1.442695, %v714_v23  ;;  %v722_v43 = vsub.f32 %v721_v39, %v714_v23 }
 0x3b1   : > { %980 = vpow2.f32 %v715_v24  ;;  %v876_v47 = vadd.f32 -0.9189385, %v722_v43 }
 0x3bb   : > { %v981_v25 = vpop.eup %980 }
 0x3bc   : > { %v718_v29 = vmul.f32 %v981_v25, %v717_v27 }
 0x3be   : > { %v719_v30 = vadd.f32 %v718_v29, %v707_v28 }
 0x3c0   : > { %982 = vtanh.f32 %v719_v30  ;;  %v725_v31 = vmul.f32 -2.0, %v719_v30  ;;  %v735_v45 = vsub.f32 0.6931472, %v719_v30 }
 0x3c2   : > { %v727_v32 = vand.u32 2147483647, %v725_v31  ;;  %v726_v41 = vmax.f32 %v725_v31, 0.0 }
 0x3c4   : > { %v728_v33 = vsub.f32 0.0, %v727_v32 }
 0x3c6   : > { %v729_v34 = vmul.f32 1.442695, %v728_v33 }
 0x3c8   : > { %984 = vpow2.f32 %v729_v34 }
 0x3ca   : > { %v983_v35 = vpop.eup %982 }
 0x3cb   : > { %745 = vst [vmem:[%s334_s18] sm:$0xff] %v983_v35 }
 0x3d2   : > { %v985_v36 = vpop.eup %984 }
 0x3d3   : > { %v731_v37 = vadd.f32 1.0, %v985_v36 }
 0x3d5   : > { %986 = vlog2.f32 %v731_v37 }
 0x3df   : > { %v987_v40 = vpop.eup %986 }
 0x3e0   : > { %v733_v42 = vmul.f32 0.6931472, %v987_v40 }
 0x3e2   : > { %v734_v44 = vadd.f32 %v733_v42, %v726_v41 }
 0x3e4   : > { %v736_v46 = vsub.f32 %v735_v45, %v734_v44 }
 0x3e6   : > { %v737_v48 = vmul.f32 2.0, %v736_v46 }
 0x3e8   : > { %v738_v49 = vsub.f32 %v876_v47, %v737_v48 }
 0x3ea   : > { %v739_v50 = vrot.slane %v738_v49, 4 }
 0x3ec   : > { %v740_v51 = vadd.f32 %v739_v50, %v738_v49 }
 0x3ee   : > { %v741_v52 = vrot.slane %v740_v51, 2 }
 0x3f0   : > { %v742_v53 = vadd.f32 %v741_v52, %v740_v51 }
 0x3f2   : > { %v743_v54 = vrot.slane %v742_v53, 1 }
 0x3f4   : > { %v744_v55 = vadd.f32 %v743_v54, %v742_v53 }
 0x3f6   : > { %746 = vst [vmem:[%s334_s18 + $0x8] sm:$0x1] %v744_v55 }
 0x3f7   : > { %1001 = shalt.err (!%p998_p7)
}
 0x3f8   : > { %s1002_s15 = scalar_lea.hbm %s1242_s29, 256  ;;  %s1006_s18 = scalar_lea.hbm %s1293_s7, 512 }
 0x3f9   : > { %p1003_p10 = scmp.ne.s32.totalorder %s1242_s29, %s1002_s15  ;;  %p1007_p13 = scmp.lt.u32.totalorder %s1242_s29, %s1293_s7 }
 0x3fa   : > { %p1008_p0 = scmp.lt.u32.totalorder %s1006_s18, %s1002_s15  ;;  %p1010_p2 = scmp.lt.u32.totalorder %s1002_s15, %s1242_s29 }
 0x3fb   : > { %p1004_p11 = pnand %p1003_p10, %p1138_p6 }
 0x3fc   : > { %p1009_p1 = por %p1008_p0, %p1007_p13 }
 0x3fd   : > { %p1005_p12 = pneg %p1004_p11 }
 0x3fe   : > { %p1011_p3 = por %p1010_p2, %p1009_p1 }
 0x400   : > { %p1012_p4 = pnand %p1011_p3, %p1005_p12 }
 0x402   : > { %1015 = shalt.err (!%p1012_p4)
}
 0x403   : > { %s1056_s23 = smov 128   ;;  %s1057_s9 = smov 256  }
 0x404   : > { %s1058_s28 = smov 8  }
 0x405   : > { %925 = dma.vmem_to_hbm [thread:$0]  (%p1138_p6), %s1237_s19, 256, %s1242_s29, %s748_s8, %s1056_s23, %s1057_s9, %s1058_s28  }
 0x406 PF: > { %s775_s13 = sand.u32 1, %s1038_s24   ;;  %p928_p5 = pnand %p842_p9, %p1142_p8 }
 0x407   : > { %s776_s14 = scalar_lea.sflag [#allocation4], %s775_s13 }
 0x408   : > { %1033 = dma.done.wait (!%p928_p5), %s776_s14, 256  }
 0x409   : > { %1035 = vsyncadd (!%p928_p5), %s776_s14, 4294967040  ;;  %p17_p7 = scmp.ge.s32.totalorder %s1124_s30, 4   ;;  %s1296_s24 = smov %s1042_s25 }
 0x40a   : > { %s1297_s25 = smov %s1046_s26  ;;  %s1298_s26 = smov %s1136_s10 }
 0x40b   : > { %s1299_s27 = smov %s1124_s30  ;;  %19 = sbr.rel (!%p17_p7) target bundleno = 3 (0x3), region = 135 }
 0x412   :  { %781 = vsyncpa [#allocation4], 1 }
 0x413   :  { %783 = vsyncpa [#allocation4 + $0x1], 1 }

</bundles_post_ra>
